<compile_context>
chip_gen: v5e
topology: v5e:2x2
jax: 0.10.0
libtpu: 0.0.40
codegen_flags: <defaults>
</compile_context>

<pallas_src>
import jax
import jax.numpy as jnp
from jax.experimental import pallas as pl
from jax.experimental.pallas import tpu as pltpu

MASK_FILL = -99999.99999

_TARGET_BLOCK_BYTES = 1 << 20   # ~1 MiB x blocks: past the ~85%-of-roofline knee
_PER_BUFFER_BUDGET = 8 << 20    # per pipeline buffer for x; double-buffered -> ~16 MiB


def _round_up(a, b):
    return (a + b - 1) // b * b


def _choose_tiles(B, N, D, itemsize):
    """Pick (TB, TN) block sizes for a (B, N, D) streaming reduction."""
    row_bytes = N * D * itemsize            # one batch row, all nodes
    if row_bytes <= _PER_BUFFER_BUDGET:
        # Keep the whole node axis in one block; batch-tile toward the target.
        tb = max(1, _TARGET_BLOCK_BYTES // row_bytes)
        if tb >= B:
            tb = B                          # whole batch in a single block
        else:
            # multiple of 8 -> sublane-dense output stores & valid out BlockSpec
            tb = min(max(8, (tb // 8) * 8), B)
        tn = N
    else:
        # Node axis alone exceeds the per-buffer budget: tile nodes too.
        tb = B if B <= 8 else 8
        node_bytes = tb * D * itemsize
        tn = max(8, (_PER_BUFFER_BUDGET // node_bytes) // 8 * 8)
        tn = min(tn, N)
    return int(tb), int(tn)


def _masked_max_kernel(x_ref, m_ref, o_ref, acc_ref):
    # x_ref: (TB, TN, D)  m_ref: (TB, TN, 1) with 1.0 == masked-out
    # o_ref: (TB, D)      acc_ref: (TB, D) f32 running max
    k = pl.program_id(1)

    @pl.when(k == 0)
    def _():
        acc_ref[...] = jnp.full_like(acc_ref, MASK_FILL)

    x = x_ref[...].astype(jnp.float32)                       # (TB, TN, D)
    is_masked = m_ref[...] > 0.5                             # (TB, TN, 1) exact 0/1
    masked = jnp.where(is_masked, jnp.float32(MASK_FILL), x)
    acc_ref[...] = jnp.maximum(acc_ref[...], jnp.max(masked, axis=1))

    @pl.when(k == pl.num_programs(1) - 1)
    def _():
        o_ref[...] = acc_ref[...].astype(o_ref.dtype)


def _add_kernel(x_ref, o_ref, acc_ref):
    # pooling='add' ignores the mask in the reference module, so it is not
    # passed in at all (no wasted DMA).  Accumulate in float32.
    k = pl.program_id(1)

    @pl.when(k == 0)
    def _():
        acc_ref[...] = jnp.zeros_like(acc_ref)

    acc_ref[...] += jnp.sum(x_ref[...].astype(jnp.float32), axis=1)

    @pl.when(k == pl.num_programs(1) - 1)
    def _():
        o_ref[...] = acc_ref[...].astype(o_ref.dtype)


def masked_global_pooling(x, adj, masks, pooling="max", *, block_b=None, block_n=None):
    """Pallas implementation of MaskedGlobalPooling.forward.

    x:     (B, N, D) float
    adj:   (B, N, N)  (unused, as in the PyTorch module)
    masks: (B, N)     float/int, 0 = masked out
    returns (B, D)
    """
    del adj  # unused in the reference forward pass
    B, N, D = x.shape
    itemsize = jnp.dtype(x.dtype).itemsize

    tb, tn = _choose_tiles(B, N, D, itemsize)
    if block_b is not None:
        tb = int(block_b)   # caller-supplied overrides must respect (8,128) rules
    if block_n is not None:
        tn = int(block_n)

    Bp = _round_up(B, tb)
    Np = _round_up(N, tn)
    grid = (Bp // tb, Np // tn)

    compiler_params = pltpu.CompilerParams(
        dimension_semantics=("parallel", "arbitrary"),
        vmem_limit_bytes=32 << 20,
    )

    if pooling == "max":
        # Compare the original mask to 0 in its native dtype (exact), then carry
        # an exact 0/1 "is_masked" indicator laid out as (B, N, 1) so N stays on
        # sublanes, matching x (no cross-lane relayout in-kernel).
        is_masked = (masks == 0).astype(x.dtype).reshape(B, N, 1)
        if (Bp, Np) != (B, N):
            x = jnp.pad(x, ((0, Bp - B), (0, Np - N), (0, 0)))
            is_masked = jnp.pad(is_masked, ((0, Bp - B), (0, Np - N), (0, 0)),
                                constant_values=1)  # padded nodes are masked out
        out = pl.pallas_call(
            _masked_max_kernel,
            out_shape=jax.ShapeDtypeStruct((Bp, D), x.dtype),
            grid_spec=pltpu.PrefetchScalarGridSpec(
                num_scalar_prefetch=0,
                grid=grid,
                in_specs=[
                    pl.BlockSpec((tb, tn, D), lambda i, k: (i, k, 0)),
                    pl.BlockSpec((tb, tn, 1), lambda i, k: (i, k, 0)),
                ],
                out_specs=pl.BlockSpec((tb, D), lambda i, k: (i, 0)),
                scratch_shapes=[pltpu.VMEM((tb, D), jnp.float32)],
            ),
            compiler_params=compiler_params,
        )(x, is_masked)
    elif pooling == "add":
        if (Bp, Np) != (B, N):
            x = jnp.pad(x, ((0, Bp - B), (0, Np - N), (0, 0)))  # zeros: sum unchanged
        out = pl.pallas_call(
            _add_kernel,
            out_shape=jax.ShapeDtypeStruct((Bp, D), x.dtype),
            grid_spec=pltpu.PrefetchScalarGridSpec(
                num_scalar_prefetch=0,
                grid=grid,
                in_specs=[pl.BlockSpec((tb, tn, D), lambda i, k: (i, k, 0))],
                out_specs=pl.BlockSpec((tb, D), lambda i, k: (i, 0)),
                scratch_shapes=[pltpu.VMEM((tb, D), jnp.float32)],
            ),
            compiler_params=compiler_params,
        )(x)
    else:
        raise NotImplementedError("Not Implemented")

    return out[:B]


def _reference_max(x, masks):
    # Pure-JAX reference mirroring the PyTorch semantics.
    m = jnp.broadcast_to(masks[:, :, None], x.shape)
    xm = jnp.where(m == 0, jnp.asarray(MASK_FILL, x.dtype), x)
    return jnp.max(xm, axis=1)


def _reference_add(x):
    return jnp.sum(x, axis=1)


if __name__ == "__main__":
    key = jax.random.PRNGKey(0)

    # --- small shape matching the module's typical use -----------------------
    B, N, D = 2, 8, 32  # batch, nodes, feature dim
    kx, kadj, km = jax.random.split(key, 3)
    x = jax.random.normal(kx, (B, N, D), dtype=jnp.float32)
    adj = (jax.random.uniform(kadj, (B, N, N)) > 0.5).astype(jnp.float32)
    masks = (jax.random.uniform(km, (B, N)) > 0.3).astype(jnp.float32)
    masks = masks.at[:, 0].set(1.0)  # guarantee at least one valid node per graph

    out = jax.block_until_ready(masked_global_pooling(x, adj, masks, pooling="max"))
    ref = _reference_max(x, masks)
    assert out.shape == (B, D)
    assert jnp.allclose(out, ref, atol=1e-6, rtol=1e-6), "max pooling mismatch"

    out_add = jax.block_until_ready(masked_global_pooling(x, adj, masks, pooling="add"))
    assert jnp.allclose(out_add, _reference_add(x), atol=1e-5, rtol=1e-5), "add mismatch"

    # --- larger shape: exercises batch tiling + batch padding ----------------
    B2, N2, D2 = 20, 256, 128
    k2x, k2m = jax.random.split(jax.random.PRNGKey(1), 2)
    x2 = jax.random.normal(k2x, (B2, N2, D2), dtype=jnp.float32)
    m2 = (jax.random.uniform(k2m, (B2, N2)) > 0.3).astype(jnp.float32)
    m2 = m2.at[:, 0].set(1.0)
    adj2 = jnp.zeros((B2, N2, N2), dtype=jnp.float32)
    out2 = jax.block_until_ready(masked_global_pooling(x2, adj2, m2, pooling="max"))
    assert jnp.allclose(out2, _reference_max(x2, m2), atol=1e-6, rtol=1e-6), \
        "tiled max pooling mismatch"

    # --- forced node-axis tiling: exercises the running-max accumulator ------
    B3, N3, D3 = 4, 16, 128
    k3x, k3m = jax.random.split(jax.random.PRNGKey(2), 2)
    x3 = jax.random.normal(k3x, (B3, N3, D3), dtype=jnp.float32)
    m3 = (jax.random.uniform(k3m, (B3, N3)) > 0.3).astype(jnp.float32)
    m3 = m3.at[:, 0].set(1.0)
    adj3 = jnp.zeros((B3, N3, N3), dtype=jnp.float32)
    out3 = jax.block_until_ready(
        masked_global_pooling(x3, adj3, m3, pooling="max", block_b=4, block_n=8))
    assert jnp.allclose(out3, _reference_max(x3, m3), atol=1e-6, rtol=1e-6), \
        "node-tiled max pooling mismatch"
    out3a = jax.block_until_ready(
        masked_global_pooling(x3, adj3, m3, pooling="add", block_b=4, block_n=8))
    assert jnp.allclose(out3a, _reference_add(x3), atol=1e-5, rtol=1e-5), \
        "node-tiled add pooling mismatch"

    print("KERNEL_OK")
</pallas_src>

<mosaic_0001>
module attributes {stable_mosaic.version = 11 : i64} {
  func.func @_masked_max_kernel(%arg0: i32, %arg1: i32, %arg2: memref<2x8x32xf32, #tpu.memory_space<vmem>>, %arg3: memref<2x8x1xf32, #tpu.memory_space<vmem>>, %arg4: memref<2x32xf32, #tpu.memory_space<vmem>>, %arg5: memref<2x32xf32, #tpu.memory_space<vmem>>) attributes {dimension_semantics = [#tpu.dimension_semantics<parallel>, #tpu.dimension_semantics<arbitrary>], iteration_bounds = array<i64: 1, 1>, scalar_prefetch = 0 : i64, scratch_operands = 1 : i64, tpu.core_type = #tpu.core_type<tc>, window_params = [{transform_indices = @transform_0, window_bounds = array<i64: 2, 8, 32>}, {transform_indices = @transform_1, window_bounds = array<i64: 2, 8, 1>}, {transform_indices = @transform_2, window_bounds = array<i64: 2, 32>}]} {
    %c0_i32 = arith.constant 0 : i32
    %0 = arith.cmpi eq, %arg1, %c0_i32 : i32
    %1 = arith.extui %0 : i1 to i32
    %c0_i32_0 = arith.constant 0 : i32
    %2 = arith.cmpi ne, %1, %c0_i32_0 : i32
    scf.if %2 {
      %cst_14 = arith.constant -1.000000e+05 : f32
      %18 = vector.broadcast %cst_14 : f32 to vector<2x32xf32>
      %c0_15 = arith.constant 0 : index
      %c0_16 = arith.constant 0 : index
      %19 = vector.load %arg5[%c0_15, %c0_16] : memref<2x32xf32, #tpu.memory_space<vmem>>, vector<2x32xf32>
      tpu.vector_store %arg5[%c0_15, %c0_16], %18 {strides = array<i32>} : memref<2x32xf32, #tpu.memory_space<vmem>>, vector<2x32xf32>,
    } else {
    }
    %c0 = arith.constant 0 : index
    %c0_1 = arith.constant 0 : index
    %c0_2 = arith.constant 0 : index
    %3 = vector.load %arg2[%c0, %c0_1, %c0_2] : memref<2x8x32xf32, #tpu.memory_space<vmem>>, vector<2x8x32xf32>
    %c0_3 = arith.constant 0 : index
    %c0_4 = arith.constant 0 : index
    %c0_5 = arith.constant 0 : index
    %4 = vector.load %arg3[%c0_3, %c0_4, %c0_5] : memref<2x8x1xf32, #tpu.memory_space<vmem>>, vector<2x8x1xf32>
    %cst = arith.constant 5.000000e-01 : f32
    %5 = vector.broadcast %cst : f32 to vector<2x8x1xf32>
    %6 = arith.cmpf ogt, %4, %5 : vector<2x8x1xf32>
    %cst_6 = arith.constant -1.000000e+05 : f32
    %7 = vector.shape_cast %6 : vector<2x8x1xi1> to vector<2x8x1xi1>
    %8 = vector.broadcast %7 : vector<2x8x1xi1> to vector<2x8x32xi1>
    %9 = vector.broadcast %cst_6 : f32 to vector<2x8x32xf32>
    %10 = arith.select %8, %9, %3 : vector<2x8x32xi1>, vector<2x8x32xf32>
    %c0_7 = arith.constant 0 : index
    %c0_8 = arith.constant 0 : index
    %11 = vector.load %arg5[%c0_7, %c0_8] : memref<2x32xf32, #tpu.memory_space<vmem>>, vector<2x32xf32>
    %cst_9 = arith.constant dense<0xFF800000> : vector<2x32xf32>
    %12 = vector.multi_reduction <maximumf>, %10, %cst_9 [1] : vector<2x8x32xf32> to vector<2x32xf32>
    %13 = arith.maximumf %11, %12 : vector<2x32xf32>
    %c0_10 = arith.constant 0 : index
    %c0_11 = arith.constant 0 : index
    %14 = vector.load %arg5[%c0_10, %c0_11] : memref<2x32xf32, #tpu.memory_space<vmem>>, vector<2x32xf32>
    tpu.vector_store %arg5[%c0_10, %c0_11], %13 {strides = array<i32>} : memref<2x32xf32, #tpu.memory_space<vmem>>, vector<2x32xf32>,
    %c0_i32_12 = arith.constant 0 : i32
    %15 = arith.cmpi eq, %arg1, %c0_i32_12 : i32
    %16 = arith.extui %15 : i1 to i32
    %c0_i32_13 = arith.constant 0 : i32
    %17 = arith.cmpi ne, %16, %c0_i32_13 : i32
    scf.if %17 {
      %c0_14 = arith.constant 0 : index
      %c0_15 = arith.constant 0 : index
      %18 = vector.load %arg5[%c0_14, %c0_15] : memref<2x32xf32, #tpu.memory_space<vmem>>, vector<2x32xf32>
      %c0_16 = arith.constant 0 : index
      %c0_17 = arith.constant 0 : index
      %19 = vector.load %arg4[%c0_16, %c0_17] : memref<2x32xf32, #tpu.memory_space<vmem>>, vector<2x32xf32>
      tpu.vector_store %arg4[%c0_16, %c0_17], %18 {strides = array<i32>} : memref<2x32xf32, #tpu.memory_space<vmem>>, vector<2x32xf32>,
    } else {
    }
    return
  }
  func.func @transform_0(%arg0: i32, %arg1: i32) -> (i32, i32, i32) {
    %c0_i32 = arith.constant 0 : i32
    %c0_i32_0 = arith.constant 0 : i32
    return %arg0, %arg1, %c0_i32 : i32, i32, i32
  }
  func.func @transform_1(%arg0: i32, %arg1: i32) -> (i32, i32, i32) {
    %c0_i32 = arith.constant 0 : i32
    %c0_i32_0 = arith.constant 0 : i32
    return %arg0, %arg1, %c0_i32 : i32, i32, i32
  }
  func.func @transform_2(%arg0: i32, %arg1: i32) -> (i32, i32) {
    %c0_i32 = arith.constant 0 : i32
    %c0_i32_0 = arith.constant 0 : i32
    return %arg0, %c0_i32 : i32, i32
  }
}

</mosaic_0001>

<bundles_post_ra>
// kernel: tpu_custom_call.1
= control target key start
LH: loop header
LB: loop body
LE: loop exit
PB: predicated region body
PF: predicated region fallthrough
CT: control target
= control target key end

     0   :  { %s147_s0 = inlined_call_operand.vmem [shape: f32[2,8,32], index: 0, kind: input, shape index: {}]   ;;  %s148_s1 = inlined_call_operand.vmem [shape: f32[2,8,1], index: 1, kind: input, shape index: {}]   ;;  %s149_s2 = inlined_call_operand.hbm [shape: f32[2,32], index: 2, kind: output, shape index: {}]  }
   0x1   :  { %v20_v0 = vld [vmem:[%s148_s1] sm:$0xff] }
   0x2   :  { %7 = vsyncpa [#allocation4], 0  ;;  %v111_v1 = vmov 0   ;;  %vm22_vm0 = vcmp.gt.f32.partialorder %v20_v0, 0.5  ;;  %v21_v3 = vld [vmem:[%s148_s1 + $0x8] sm:$0xff]  ;;  %vm16_vm2 = vcmask 254976  }
   0x3   :  { %84 = vset.pattern.permute.xlu0 %v111_v1  ;;  %v24_v2 = vsel %vm22_vm0, 1, %v111_v1  ;;  %vm23_vm1 = vcmp.gt.f32.partialorder %v21_v3, 0.5  ;;  %v112_v5 = vmov -100000.0   ;;  %v18_v6 = vld [vmem:[%s147_s0] sm:$0xff]  ;;  %vm37_vm3 = vcmask 261120   ;;  %v19_v12 = vld [vmem:[%s147_s0 + $0x8] sm:$0xff] }
   0x4   :  { %27 = vperm.xlu0 %84, %v24_v2   ;;  %v25_v4 = vsel %vm23_vm1, 1, %v111_v1  ;;  %17 = vst.msk [vmem:[#allocation2] sm:$0x3] %vm16_vm2, %v112_v5  ;;  %vm54_vm6 = vcmask 1041409   ;;  %s113_s0 = smov [#allocation3]   ;;  %s72_s19 = sshll.u32 %s149_s2, 4  ;;  %s73_s19 = int_to_ptr.hbm [resolvable:$true] %s72_s19 }
   0x5   :  { %s70_s16 = sshll.u32 %s113_s0, 4  ;;  %s71_s16 = int_to_ptr.vmem [resolvable:$true] %s70_s16 }
   0xb   :  { %v36_v26 = vld [vmem:[#allocation2] sm:$0x3] }
   0xc   :  { %30 = vperm.xlu0 %84, %v25_v4  }
  0x76   :  { %v28_v7 = vpop.permute.xlu0 %27 }
  0x77   :  { %vm32_vm4 = vcmp.eq.s32.totalorder %v28_v7, 1 }
  0x78   :  { %v34_v8 = vsel %vm32_vm4, -100000.0, %v18_v6 }
  0x79   :  { %v38_v9 = vsel %vm37_vm3, %v34_v8, -inf }
  0x7a   :  { %v39_v10 = vrot.slane %v38_v9, 4 }
  0x7c   :  { %v40_v11 = vmax.f32 %v38_v9, %v39_v10 }
  0x7e   :  { %v31_v13 = vpop.permute.xlu0 %30  ;;  %v41_v14 = vrot.slane %v40_v11, 2 }
  0x7f   :  { %vm33_vm5 = vcmp.eq.s32.totalorder %v31_v13, 1 }
  0x80   :  { %v35_v15 = vsel %vm33_vm5, -100000.0, %v19_v12  ;;  %v42_v18 = vmax.f32 %v40_v11, %v41_v14 }
  0x81   :  { %v45_v16 = vsel %vm37_vm3, %v35_v15, -inf }
  0x82   :  { %v46_v17 = vrot.slane %v45_v16, 4  ;;  %v43_v21 = vrot.slane %v42_v18, 1 }
  0x84   :  { %v47_v19 = vmax.f32 %v45_v16, %v46_v17  ;;  %v44_v24 = vmax.f32 %v42_v18, %v43_v21 }
  0x86   :  { %v48_v20 = vrot.slane %v47_v19, 2 }
  0x88   :  { %v49_v22 = vmax.f32 %v47_v19, %v48_v20 }
  0x8a   :  { %v50_v23 = vrot.slane %v49_v22, 1 }
  0x8c   :  { %v51_v25 = vmax.f32 %v49_v22, %v50_v23 }
  0x8e   :  { %v55_v27 = vsel %vm54_vm6, %v51_v25, %v44_v24 }
  0x8f   :  { %v57_v28 = vmax.f32 %v36_v26, %v55_v27 }
  0x91   :  { %59 = vst.msk [vmem:[#allocation2] sm:$0x3] %vm16_vm2, %v57_v28 }
  0x98   :  { %v63_v29 = vld [vmem:[#allocation2] sm:$0x3] }
  0x99   :  { %64 = vst.msk [vmem:[#allocation3] sm:$0x3] %vm16_vm2, %v63_v29 }
  0x9a   :  { %75 = dma.vmem_to_hbm [thread:$0]  %s71_s16, 32, %s73_s19, [#allocation4]  }
  0x9b   :  { %109 = dma.done.wait [#allocation4], 32  }
  0x9c   :  { %110 = vsyncadd [#allocation4], 4294967264 }
  0x9d   :  { %80 = vsyncpa [#allocation4], 1 }

</bundles_post_ra>
